<compile_context>
chip_gen: v6e
topology: v6e:2x2x1
jax: 0.10.0
libtpu: 0.0.40
codegen_flags: <defaults>
</compile_context>

<pallas_src>
import jax
import jax.numpy as jnp
from jax import lax
from jax.experimental import pallas as pl
from jax.experimental.pallas import tpu as pltpu

_EPS = 1e-8  # PyTorch F.cosine_similarity default eps


def _cos_partial_kernel(x_ref, y_ref, o_ref, acc_ref):
    # grid = (splits, steps); axis 1 is the reduction over row tiles.
    i = pl.program_id(1)

    @pl.when(i == 0)
    def _init():
        acc_ref[...] = jnp.zeros_like(acc_ref)

    x = x_ref[...].astype(jnp.float32)  # (row_tile, D)
    y = y_ref[...].astype(jnp.float32)

    dot = jnp.sum(x * y, axis=-1, keepdims=True)   # (row_tile, 1)
    nx2 = jnp.sum(x * x, axis=-1, keepdims=True)   # (row_tile, 1)
    ny2 = jnp.sum(y * y, axis=-1, keepdims=True)   # (row_tile, 1)

    # dot / max(|x||y|, eps) == dot * rsqrt(max(|x|^2 |y|^2, eps^2)); one EUP op.
    cos = dot * lax.rsqrt(jnp.maximum(nx2 * ny2, jnp.float32(_EPS * _EPS)))

    # Per-row accumulate (VPU only); full scalar reduce deferred to last step.
    acc_ref[...] += cos

    @pl.when(i == pl.num_programs(1) - 1)
    def _finalize():
        o_ref[...] = jnp.sum(acc_ref[...]).reshape(1, 1, 1)


def _round_up(a, b):
    return ((a + b - 1) // b) * b


def cosine_similarity_loss(f_compressed, f_original, *,
                           block_bytes=4 * 1024 * 1024, max_row_tile=2048):
    """loss = 1 - mean(cosine_similarity(f_compressed, f_original, dim=-1))."""
    assert f_compressed.shape == f_original.shape
    d = f_compressed.shape[-1]
    x = f_compressed.reshape(-1, d)
    y = f_original.reshape(-1, d)
    n = x.shape[0]

    # --- tile sizing: largest row tile that fits the VMEM budget -------------
    # 2 inputs x 2 pipeline buffers x (row_tile * d * itemsize) <= 4*block_bytes
    bytes_per_row = max(1, d * x.dtype.itemsize)
    row_tile = block_bytes // bytes_per_row
    row_tile = max(8, (row_tile // 8) * 8)           # multiple of 8 sublanes
    row_tile = min(row_tile, max_row_tile, _round_up(n, 8))

    total_steps = -(-n // row_tile)
    n_splits = 2 if total_steps >= 2 else 1          # 2-way TC split (v7x)
    steps_per_split = -(-total_steps // n_splits)
    n_padded = n_splits * steps_per_split * row_tile

    if n_padded != n:
        pad = n_padded - n
        # zero rows contribute exactly 0 to the cosine sum (dot == 0)
        x = jnp.pad(x, ((0, pad), (0, 0)))
        y = jnp.pad(y, ((0, pad), (0, 0)))

    cost = pl.CostEstimate(
        flops=int(6 * n * d),
        transcendentals=int(n),
        bytes_accessed=int(2 * n_padded * d * x.dtype.itemsize) + 4 * n_splits,
    )

    partials = pl.pallas_call(
        _cos_partial_kernel,
        out_shape=jax.ShapeDtypeStruct((n_splits, 1, 1), jnp.float32),
        grid_spec=pltpu.PrefetchScalarGridSpec(
            num_scalar_prefetch=0,
            grid=(n_splits, steps_per_split),
            in_specs=[
                pl.BlockSpec((row_tile, d),
                             lambda c, i: (c * steps_per_split + i, 0)),
                pl.BlockSpec((row_tile, d),
                             lambda c, i: (c * steps_per_split + i, 0)),
            ],
            out_specs=pl.BlockSpec((1, 1, 1), lambda c, i: (c, 0, 0)),
            scratch_shapes=[pltpu.VMEM((row_tile, 1), jnp.float32)],
        ),
        compiler_params=pltpu.CompilerParams(
            dimension_semantics=("parallel", "arbitrary"),
            vmem_limit_bytes=32 * 1024 * 1024,
        ),
        cost_estimate=cost,
    )(x, y)

    total_cos = jnp.sum(partials)
    return 1.0 - total_cos / jnp.float32(n)


def _reference_loss(x, y):
    x32 = x.astype(jnp.float32)
    y32 = y.astype(jnp.float32)
    dot = jnp.sum(x32 * y32, axis=-1)
    nx = jnp.linalg.norm(x32, axis=-1)
    ny = jnp.linalg.norm(y32, axis=-1)
    cos = dot / jnp.maximum(nx * ny, _EPS)
    return 1.0 - jnp.mean(cos)


if __name__ == "__main__":
    # small shapes consistent with the forward: (batch, seq, hidden)
    B, S, D = 2, 8, 32
    key = jax.random.PRNGKey(0)
    k1, k2 = jax.random.split(key)
    f_compressed = jax.random.normal(k1, (B, S, D), dtype=jnp.float32)
    f_original = jax.random.normal(k2, (B, S, D), dtype=jnp.float32)

    loss = cosine_similarity_loss(f_compressed, f_original)
    loss = jax.block_until_ready(loss)

    ref = _reference_loss(f_compressed, f_original)
    assert jnp.allclose(loss, ref, atol=1e-5, rtol=1e-5), (loss, ref)
    print("KERNEL_OK")
</pallas_src>

<mosaic_0001>
module attributes {stable_mosaic.version = 11 : i64} {
  func.func @_cos_partial_kernel(%arg0: i32, %arg1: i32, %arg2: memref<16x32xf32, #tpu.memory_space<vmem>>, %arg3: memref<16x32xf32, #tpu.memory_space<vmem>>, %arg4: memref<1x1x1xf32, #tpu.memory_space<vmem>>, %arg5: memref<16x1xf32, #tpu.memory_space<vmem>>) attributes {dimension_semantics = [#tpu.dimension_semantics<parallel>, #tpu.dimension_semantics<arbitrary>], iteration_bounds = array<i64: 1, 1>, scalar_prefetch = 0 : i64, scratch_operands = 1 : i64, tpu.core_type = #tpu.core_type<tc>, window_params = [{transform_indices = @transform_0, window_bounds = array<i64: 16, 32>}, {transform_indices = @transform_1, window_bounds = array<i64: 16, 32>}, {transform_indices = @transform_2, window_bounds = array<i64: 1, 1, 1>}]} {
    %c0_i32 = arith.constant 0 : i32
    %0 = arith.cmpi eq, %arg1, %c0_i32 : i32
    %1 = arith.extui %0 : i1 to i32
    %c0_i32_0 = arith.constant 0 : i32
    %2 = arith.cmpi ne, %1, %c0_i32_0 : i32
    scf.if %2 {
      %cst_13 = arith.constant 0.000000e+00 : f32
      %25 = vector.broadcast %cst_13 : f32 to vector<16x1xf32>
      %c0_14 = arith.constant 0 : index
      %c0_15 = arith.constant 0 : index
      %26 = vector.load %arg5[%c0_14, %c0_15] : memref<16x1xf32, #tpu.memory_space<vmem>>, vector<16x1xf32>
      tpu.vector_store %arg5[%c0_14, %c0_15], %25 {strides = array<i32>} : memref<16x1xf32, #tpu.memory_space<vmem>>, vector<16x1xf32>,
    } else {
    }
    %c0 = arith.constant 0 : index
    %c0_1 = arith.constant 0 : index
    %3 = vector.load %arg2[%c0, %c0_1] : memref<16x32xf32, #tpu.memory_space<vmem>>, vector<16x32xf32>
    %c0_2 = arith.constant 0 : index
    %c0_3 = arith.constant 0 : index
    %4 = vector.load %arg3[%c0_2, %c0_3] : memref<16x32xf32, #tpu.memory_space<vmem>>, vector<16x32xf32>
    %5 = arith.mulf %3, %4 : vector<16x32xf32>
    %cst = arith.constant dense<0.000000e+00> : vector<16xf32>
    %6 = vector.multi_reduction <add>, %5, %cst [1] : vector<16x32xf32> to vector<16xf32>
    %7 = vector.shape_cast %6 : vector<16xf32> to vector<16x1xf32>
    %8 = arith.mulf %3, %3 : vector<16x32xf32>
    %cst_4 = arith.constant dense<0.000000e+00> : vector<16xf32>
    %9 = vector.multi_reduction <add>, %8, %cst_4 [1] : vector<16x32xf32> to vector<16xf32>
    %10 = vector.shape_cast %9 : vector<16xf32> to vector<16x1xf32>
    %11 = arith.mulf %4, %4 : vector<16x32xf32>
    %cst_5 = arith.constant dense<0.000000e+00> : vector<16xf32>
    %12 = vector.multi_reduction <add>, %11, %cst_5 [1] : vector<16x32xf32> to vector<16xf32>
    %13 = vector.shape_cast %12 : vector<16xf32> to vector<16x1xf32>
    %14 = arith.mulf %10, %13 : vector<16x1xf32>
    %cst_6 = arith.constant 1.000000e-16 : f32
    %15 = vector.broadcast %cst_6 : f32 to vector<16x1xf32>
    %16 = arith.maximumf %14, %15 : vector<16x1xf32>
    %17 = math.rsqrt %16 : vector<16x1xf32>
    %18 = arith.mulf %7, %17 : vector<16x1xf32>
    %c0_7 = arith.constant 0 : index
    %c0_8 = arith.constant 0 : index
    %19 = vector.load %arg5[%c0_7, %c0_8] : memref<16x1xf32, #tpu.memory_space<vmem>>, vector<16x1xf32>
    %20 = arith.addf %19, %18 : vector<16x1xf32>
    %c0_9 = arith.constant 0 : index
    %c0_10 = arith.constant 0 : index
    %21 = vector.load %arg5[%c0_9, %c0_10] : memref<16x1xf32, #tpu.memory_space<vmem>>, vector<16x1xf32>
    tpu.vector_store %arg5[%c0_9, %c0_10], %20 {strides = array<i32>} : memref<16x1xf32, #tpu.memory_space<vmem>>, vector<16x1xf32>,
    %c0_i32_11 = arith.constant 0 : i32
    %22 = arith.cmpi eq, %arg1, %c0_i32_11 : i32
    %23 = arith.extui %22 : i1 to i32
    %c0_i32_12 = arith.constant 0 : i32
    %24 = arith.cmpi ne, %23, %c0_i32_12 : i32
    scf.if %24 {
      %c0_13 = arith.constant 0 : index
      %c0_14 = arith.constant 0 : index
      %25 = vector.load %arg5[%c0_13, %c0_14] : memref<16x1xf32, #tpu.memory_space<vmem>>, vector<16x1xf32>
      %26 = vector.shape_cast %25 : vector<16x1xf32> to vector<1x16x1xf32>
      %cst_15 = arith.constant dense<0.000000e+00> : vector<1xf32>
      %27 = vector.multi_reduction <add>, %26, %cst_15 [1, 2] : vector<1x16x1xf32> to vector<1xf32>
      %28 = vector.shape_cast %27 : vector<1xf32> to vector<1x1x1xf32>
      %29 = vector.extract %28[0, 0, 0] : f32 from vector<1x1x1xf32>
      %30 = vector.broadcast %29 : f32 to vector<1x1x1xf32>
      %c0_16 = arith.constant 0 : index
      %c0_17 = arith.constant 0 : index
      %c0_18 = arith.constant 0 : index
      %31 = vector.load %arg4[%c0_16, %c0_17, %c0_18] : memref<1x1x1xf32, #tpu.memory_space<vmem>>, vector<1x1x1xf32>
      tpu.vector_store %arg4[%c0_16, %c0_17, %c0_18], %30 {strides = array<i32>} : memref<1x1x1xf32, #tpu.memory_space<vmem>>, vector<1x1x1xf32>,
    } else {
    }
    return
  }
  func.func @transform_0(%arg0: i32, %arg1: i32) -> (i32, i32) {
    %c1_i32 = arith.constant 1 : i32
    %0 = arith.muli %arg0, %c1_i32 : i32
    %1 = arith.addi %0, %arg1 : i32
    %c0_i32 = arith.constant 0 : i32
    %c0_i32_0 = arith.constant 0 : i32
    return %1, %c0_i32 : i32, i32
  }
  func.func @transform_1(%arg0: i32, %arg1: i32) -> (i32, i32) {
    %c1_i32 = arith.constant 1 : i32
    %0 = arith.muli %arg0, %c1_i32 : i32
    %1 = arith.addi %0, %arg1 : i32
    %c0_i32 = arith.constant 0 : i32
    %c0_i32_0 = arith.constant 0 : i32
    return %1, %c0_i32 : i32, i32
  }
  func.func @transform_2(%arg0: i32, %arg1: i32) -> (i32, i32, i32) {
    %c0_i32 = arith.constant 0 : i32
    %c0_i32_0 = arith.constant 0 : i32
    %c0_i32_1 = arith.constant 0 : i32
    return %arg0, %c0_i32, %c0_i32_0 : i32, i32, i32
  }
}

</mosaic_0001>

<bundles_post_ra>
// kernel: tpu_custom_call.1
= control target key start
LH: loop header
LB: loop body
LE: loop exit
PB: predicated region body
PF: predicated region fallthrough
CT: control target
= control target key end

     0   :  { %7 = vsyncpa [#allocation4], 0  ;;  %s259_s0 = inlined_call_operand.hbm [shape: f32[16,32], index: 0, kind: input, shape index: {}]   ;;  %s260_s1 = inlined_call_operand.hbm [shape: f32[16,32], index: 1, kind: input, shape index: {}]   ;;  %s261_s2 = inlined_call_operand.hbm [shape: f32[1,1,1], index: 2, kind: output, shape index: {}]  }
   0x1   :  { %8 = vsyncpa [#allocation7], 0 }
   0x2   :  { %9 = vsyncpa [#allocation5], 0  ;;  %s217_s9 = smov [#allocation3]  }
   0x3   :  { %s19_s10 = sshll.u32 %s217_s9, 4  ;;  %s20_s10 = int_to_ptr.vmem [resolvable:$true] %s19_s10 }
   0x4   :  { %s159_s11 = scalar_lea.vmem %s20_s10, 256  ;;  %p164_p1 = scmp.lt.s32.totalorder %s20_s10, %s20_s10 }
   0x5   :  { %p160_p0 = scmp.ne.s32.totalorder %s20_s10, %s159_s11  ;;  %p165_p2 = scmp.lt.s32.totalorder %s159_s11, %s159_s11 }
   0x7   :  { %p166_p3 = por %p165_p2, %p164_p1 }
   0x9   :  { %p167_p4 = pnand %p166_p3, %p160_p0 }
   0xb   :  { %170 = shalt.err (!%p167_p4)
}
   0xc   :  { %s218_s12 = smov 128   ;;  %s219_s13 = smov 8  }
   0xd   :  { %25 = dma.hbm_to_vmem [thread:$0]  %s259_s0, 256, %s20_s10, [#allocation4], %s218_s12, %s218_s12, %s219_s13  }
   0xe   :  { %s220_s16 = smov [#allocation6]  }
   0xf   :  { %s35_s17 = sshll.u32 %s220_s16, 4  ;;  %s36_s17 = int_to_ptr.vmem [resolvable:$true] %s35_s17 }
  0x10   :  { %s179_s18 = scalar_lea.vmem %s36_s17, 256  ;;  %p184_p6 = scmp.lt.s32.totalorder %s36_s17, %s36_s17 }
  0x11   :  { %p180_p5 = scmp.ne.s32.totalorder %s36_s17, %s179_s18  ;;  %p185_p7 = scmp.lt.s32.totalorder %s179_s18, %s179_s18 }
  0x13   :  { %p186_p8 = por %p185_p7, %p184_p6 }
  0x15   :  { %p187_p9 = pnand %p186_p8, %p180_p5 }
  0x17   :  { %190 = shalt.err (!%p187_p9)
}
  0x18   :  { %41 = dma.hbm_to_vmem [thread:$0]  %s260_s1, 256, %s36_s17, [#allocation7], %s218_s12, %s218_s12, %s219_s13  }
  0x19   :  { %211 = dma.done.wait [#allocation4], 256  }
  0x1a   :  { %212 = vsyncadd [#allocation4], 4294967040 }
  0x1b   :  { %213 = dma.done.wait [#allocation7], 256  }
  0x1c   :  { %214 = vsyncadd [#allocation7], 4294967040  ;;  %v61_v0 = vld [vmem:[#allocation6] sm:$0xff]  ;;  %vm65_vm0 = vcmask 261120   ;;  %v59_v1 = vld [vmem:[#allocation3] sm:$0xff]  ;;  %vm56_vm1 = vcmask 7168  }
  0x1d   :  { %v62_v2 = vld [vmem:[#allocation6 + $0x8] sm:$0xff]  ;;  %v80_v3 = vmul.f32 %v61_v0, %v61_v0  ;;  %v72_v4 = vmul.f32 %v59_v1, %v59_v1  ;;  %v60_v6 = vld [vmem:[#allocation3 + $0x8] sm:$0xff]  ;;  %v63_v12 = vmul.f32 %v61_v0, %v59_v1  ;;  %v221_v16 = vmov 0.0   ;;  %s222_s0 = smov [#allocation8]  }
  0x1e   :  { %v81_v5 = vmul.f32 %v62_v2, %v62_v2  ;;  %v73_v7 = vmul.f32 %v60_v6, %v60_v6  ;;  %v64_v13 = vmul.f32 %v62_v2, %v60_v6  ;;  %57 = vst.msk [vmem:[#allocation2] sm:$0xff] %vm56_vm1, %v221_v16  ;;  %58 = vst.msk [vmem:[#allocation2 + $0x8] sm:$0xff] %vm56_vm1, %v221_v16  ;;  %s129_s1 = sshll.u32 %s222_s0, 4  ;;  %vm121_vm2 = vcmask 0   ;;  %s130_s1 = int_to_ptr.vmem [resolvable:$true] %s129_s1 }
  0x1f   :  { %v82_v8 = vsel %vm65_vm0, %v80_v3, 0.0  ;;  %v74_v9 = vsel %vm65_vm0, %v72_v4, 0.0  ;;  %v66_v14 = vsel %vm65_vm0, %v63_v12, 0.0  ;;  %s191_s22 = scalar_lea.vmem %s130_s1, 16  ;;  %s195_s23 = scalar_lea.vmem %s130_s1, 32 }
  0x20   :  { %83 = vadd.xlane.f32.xlu1 %v82_v8  ;;  %75 = vadd.xlane.f32.xlu0 %v74_v9  ;;  %v85_v10 = vsel %vm65_vm0, %v81_v5, 0.0  ;;  %v77_v11 = vsel %vm65_vm0, %v73_v7, 0.0  ;;  %v69_v15 = vsel %vm65_vm0, %v64_v13, 0.0  ;;  %p192_p10 = scmp.ne.s32.totalorder %s130_s1, %s191_s22  ;;  %p196_p11 = scmp.lt.s32.totalorder %s130_s1, %s130_s1 }
  0x21   :  { %p197_p12 = scmp.lt.s32.totalorder %s195_s23, %s191_s22 }
  0x23   :  { %p198_p13 = por %p197_p12, %p196_p11 }
  0x24   :  { %86 = vadd.xlane.f32.xlu1 %v85_v10  ;;  %78 = vadd.xlane.f32.xlu0 %v77_v11 }
  0x25   :  { %v96_v27 = vld [vmem:[#allocation2] sm:$0xff]  ;;  %v97_v32 = vld [vmem:[#allocation2 + $0x8] sm:$0xff]  ;;  %p199_p0 = pnand %p198_p13, %p192_p10 }
  0x28   :  { %67 = vadd.xlane.f32.xlu0 %v66_v14  ;;  %70 = vadd.xlane.f32.xlu1 %v69_v15 }
  0xa9   :  { %v84_v17 = vpop.xlane.xlu1 %83  ;;  %v76_v18 = vpop.xlane.xlu0 %75 }
  0xaa   :  { %v88_v19 = vmul.f32 %v84_v17, %v76_v18 }
  0xac   :  { %v90_v20 = vmax.f32 %v88_v19, 1e-16 }
  0xad   :  { %v87_v21 = vpop.xlane.xlu1 %86  ;;  %v79_v22 = vpop.xlane.xlu0 %78 }
  0xae   :  { %147 = vrsqrt.f32 %v90_v20  ;;  %v89_v23 = vmul.f32 %v87_v21, %v79_v22 }
  0xb0   :  { %v91_v24 = vmax.f32 %v89_v23, 1e-16 }
  0xb1   :  { %v68_v25 = vpop.xlane.xlu0 %67  ;;  %v71_v29 = vpop.xlane.xlu1 %70 }
  0xb2   :  { %149 = vrsqrt.f32 %v91_v24 }
  0xbb   :  { %v148_v26 = vpop.eup %147 }
  0xbc   :  { %v94_v28 = vmul.f32 %v148_v26, %v68_v25 }
  0xbe   :  { %v98_v30 = vadd.f32 %v96_v27, %v94_v28 }
  0xbf   :  { %v150_v31 = vpop.eup %149 }
  0xc0   :  { %101 = vst.msk [vmem:[#allocation2] sm:$0xff] %vm56_vm1, %v98_v30  ;;  %v95_v33 = vmul.f32 %v150_v31, %v71_v29 }
  0xc2   :  { %v99_v34 = vadd.f32 %v97_v32, %v95_v33 }
  0xc4   :  { %102 = vst.msk [vmem:[#allocation2 + $0x8] sm:$0xff] %vm56_vm1, %v99_v34 }
  0xc7   :  { %v106_v35 = vld [vmem:[#allocation2] sm:$0xff] }
  0xc8   :  { %v108_v37 = vsel %vm56_vm1, %v106_v35, 0.0 }
  0xcb   :  { %v107_v36 = vld [vmem:[#allocation2 + $0x8] sm:$0xff] }
  0xcc   :  { %v109_v38 = vsel %vm56_vm1, %v107_v36, 0.0 }
  0xcd   :  { %v110_v39 = vadd.f32 %v109_v38, %v108_v37 }
  0xcf   :  { %111 = vadd.xlane.f32.xlu0 %v110_v39 }
 0x158   :  { %v112_v40 = vpop.xlane.xlu0 %111 }
 0x159   :  { %v113_v41 = vrot.slane %v112_v40, 4 }
 0x15b   :  { %v114_v42 = vadd.f32 %v113_v41, %v112_v40 }
 0x15d   :  { %v115_v43 = vrot.slane %v114_v42, 2 }
 0x15f   :  { %v116_v44 = vadd.f32 %v115_v43, %v114_v42 }
 0x161   :  { %v117_v45 = vrot.slane %v116_v44, 1 }
 0x163   :  { %v118_v46 = vadd.f32 %v117_v45, %v116_v44 }
 0x165   :  { %139 = vpush %v118_v46 }
 0x196   :  { %s140_s21 = spop %139 }
 0x197   :  { %v120_v47 = vstv %s140_s21 }
 0x198   :  { %122 = vst.msk [vmem:[#allocation8] sm:$0x1] %vm121_vm2, %v120_v47 }
 0x199   :  { %202 = shalt.err (!%p199_p0)
}
 0x19a   :  { %132 = dma.vmem_to_hbm [thread:$0]  %s130_s1, 16, %s261_s2, [#allocation5]  }
 0x19b   :  { %215 = dma.done.wait [#allocation5], 16  }
 0x19c   :  { %216 = vsyncadd [#allocation5], 4294967280 }
 0x19d   :  { %136 = vsyncpa [#allocation4], 1 }
 0x19e   :  { %137 = vsyncpa [#allocation7], 1 }
 0x19f   :  { %138 = vsyncpa [#allocation5], 1 }

</bundles_post_ra>
